<compile_context>
chip_gen: v7x
topology: tpu7x:2x2x1
jax: 0.10.0
libtpu: 0.0.40
codegen_flags: <defaults>
</compile_context>

<pallas_src>
import jax
import jax.numpy as jnp
from jax.experimental import pallas as pl
from jax.experimental.pallas import tpu as pltpu

_MIB = 1024 * 1024


def _vmem_capacity_bytes():
    """Per-TensorCore VMEM capacity; conservative 64 MiB (v7x-sized) fallback."""
    try:
        return int(pltpu.get_tpu_info().vmem_capacity_bytes)
    except Exception:
        return 64 * _MIB


def _vmem_bytes(tm, tf, h, in_bytes, out_bytes):
    """Estimated VMEM working set: double-buffered tiles + f32 accumulator +
    the in-kernel intermediates (gu / p / act in f32, plus bf16 copy of act)."""
    x_b = 2 * tm * h * in_bytes                     # x tile (double-buffered)
    w_b = 2 * 3 * h * tf * in_bytes                 # w13 ([h,2tf]) + w2 ([tf,h]), double-buffered
    o_b = 2 * tm * h * out_bytes                    # output tile
    acc = tm * h * 4                                # f32 accumulator scratch
    inter = 4 * tm * tf * 4 + tm * tf * in_bytes    # gu(2x) + p + act f32, act bf16 re-cast
    return x_b + w_b + o_b + acc + inter


def get_tile_config(tokens, h, f, *, compute_dtype=jnp.bfloat16, out_dtype=jnp.float32):
    """Generation-aware (tm, tf, vmem_limit_bytes) choice.

    Arithmetic intensity on the streamed weights is ~tm FLOP/byte, so tm must
    exceed the chip's compute/bandwidth threshold (~680 on v6e, ~310 per-TC on
    v7x, ~240 on v5e) for the kernel to be MXU-bound on prefill.
    """
    in_bytes = jnp.dtype(compute_dtype).itemsize
    out_bytes = jnp.dtype(out_dtype).itemsize
    vmem_cap = _vmem_capacity_bytes()

    if vmem_cap >= 100 * _MIB:
        # 128 MiB parts (v5e / v6e): large token tile => weights streamed once
        # per 1024 tokens; large ffn chunk => fewer reduction steps.
        budget, tm_cap, dual_tc = 100 * _MIB, 1024, False
        vmem_limit = min(112 * _MIB, vmem_cap - 8 * _MIB)
    else:
        # 64 MiB per-TC parts (v7x): tm=512 already clears the ~310 FLOP/byte
        # threshold; leave headroom below the 64 MiB physical ceiling.
        budget, tm_cap, dual_tc = 52 * _MIB, 512, True
        vmem_limit = min(56 * _MIB, vmem_cap - 8 * _MIB)

    tm = tokens if tokens <= tm_cap else tm_cap

    def pick_tf(tm_):
        if f <= 256:
            return f
        tf_ = 2048
        while tf_ > 128 and _vmem_bytes(tm_, tf_, h, in_bytes, out_bytes) > budget:
            tf_ //= 2
        return min(tf_, f)

    tf = pick_tf(tm)
    # Shrink the token tile if even a 128-wide ffn chunk blows the budget
    # (very large hidden dims); keep tm a multiple of 8 for the (8,128) rule.
    while tm > 128 and _vmem_bytes(tm, min(tf, 128), h, in_bytes, out_bytes) > budget:
        tm = max(128, ((tm // 2 + 7) // 8) * 8)
        tf = pick_tf(tm)

    # v7x has 2 TensorCores per chip sharing the "parallel" token axis: ensure
    # >= 2 token blocks when there is enough work so neither TC idles.
    if dual_tc and tokens >= 256 and pl.cdiv(tokens, tm) < 2:
        tm = max(128, ((pl.cdiv(tokens, 2) + 7) // 8) * 8)

    return tm, tf, int(max(vmem_limit, 32 * _MIB))


def prepare_weights(w1, w3, w2, tf, *, compute_dtype=jnp.bfloat16):
    """Cast weights to the compute dtype, zero-pad the ffn axis to a multiple
    of tf, and interleave w1/w3 per-chunk into one [hidden, grid_f*2*tf]
    operand so block k of the stacked operand is [w1_k | w3_k] (one DMA, one
    MXU pass for gate+up).  Hoist this out of the hot path: it re-reads the
    full-precision weights from HBM, which would otherwise cost about as much
    as the kernel itself for decode-sized token counts."""
    h, f = w1.shape
    grid_f = pl.cdiv(f, tf)
    f_pad = grid_f * tf
    w1c = w1.astype(compute_dtype)
    w3c = w3.astype(compute_dtype)
    w2c = w2.astype(compute_dtype)
    if f_pad != f:
        # Padded columns contribute exactly SiLU(0*0) @ 0 == 0 to the output.
        w1c = jnp.pad(w1c, ((0, 0), (0, f_pad - f)))
        w3c = jnp.pad(w3c, ((0, 0), (0, f_pad - f)))
        w2c = jnp.pad(w2c, ((0, f_pad - f), (0, 0)))
    w13 = jnp.concatenate(
        [w1c.reshape(h, grid_f, tf), w3c.reshape(h, grid_f, tf)], axis=2
    ).reshape(h, grid_f * 2 * tf)
    return w13, w2c, tf


def _sparse_top2_mlp_kernel(x_ref, w13_ref, w2_ref, o_ref, acc_ref):
    # x_ref  : [tm, hidden]        token tile (resident across the ffn loop)
    # w13_ref: [hidden, 2*tf]      streamed ffn chunk: [w1_k | w3_k]
    # w2_ref : [tf, hidden]        streamed ffn chunk of f2 weights
    # o_ref  : [tm, hidden]        written once per token tile
    # acc_ref: [tm, hidden] f32    persistent VMEM accumulator
    k = pl.program_id(1)

    @pl.when(k == 0)
    def _():
        acc_ref[...] = jnp.zeros_like(acc_ref)

    tf = w2_ref.shape[0]
    x = x_ref[...]
    # One MXU pass produces both the gate and up projections for this chunk.
    gu = jnp.dot(x, w13_ref[...], preferred_element_type=jnp.float32)
    g = gu[:, :tf]          # f1(h) chunk (lane-aligned slice when tf % 128 == 0)
    u = gu[:, tf:]          # f3(h) chunk
    p = g * u
    act = p * jax.nn.sigmoid(p)                                     # SiLU(f1(h) * f3(h)), f32 math
    acc_ref[...] += jnp.dot(act.astype(w2_ref.dtype), w2_ref[...],
                            preferred_element_type=jnp.float32)     # partial f2(.)

    @pl.when(k == pl.num_programs(1) - 1)
    def _():
        o_ref[...] = acc_ref[...].astype(o_ref.dtype)


def sparse_top2_mlp(hidden_state, w1, w3, w2, *, compute_dtype=jnp.bfloat16, prepared=None):
    """hidden_state: [batch, seq, hidden]; w1, w3: [hidden, ffn]; w2: [ffn, hidden].

    Pass `prepared = prepare_weights(w1, w3, w2, tf)` to keep the per-call
    weight cast / pad / stack out of the hot path.
    """
    b, s, h = hidden_state.shape
    f = w1.shape[1]
    tokens = b * s

    tm, tf, vmem_limit = get_tile_config(
        tokens, h, f, compute_dtype=compute_dtype, out_dtype=hidden_state.dtype)

    if prepared is None:
        # Convenience path only; production callers should hoist this.
        prepared = prepare_weights(w1, w3, w2, tf, compute_dtype=compute_dtype)
    w13, w2p, tf = prepared
    f_pad = w2p.shape[0]
    assert f_pad % tf == 0 and w13.shape == (h, 2 * f_pad)

    x = hidden_state.reshape(tokens, h).astype(compute_dtype)
    grid_m = pl.cdiv(tokens, tm)
    grid_f = f_pad // tf

    # Partial last token tile: out-of-bounds block rows carry garbage but every
    # output row depends only on its own x row (rowwise kernel), and Pallas
    # clips the writeback to in-bounds rows — correct.  Do not introduce
    # cross-row coupling (e.g. token-axis reductions) without revisiting this.
    #
    # Note: for production keep hidden a multiple of 128 (lane-dense, unmasked
    # stores); the small test config (hidden=32) emits masked stores.
    out = pl.pallas_call(
        _sparse_top2_mlp_kernel,
        out_shape=jax.ShapeDtypeStruct((tokens, h), hidden_state.dtype),
        grid=(grid_m, grid_f),
        in_specs=[
            pl.BlockSpec((tm, h), lambda i, k: (i, 0)),      # x: resident across ffn loop
            pl.BlockSpec((h, 2 * tf), lambda i, k: (0, k)),  # [w1_k | w3_k]: streamed along ffn
            pl.BlockSpec((tf, h), lambda i, k: (k, 0)),      # w2: streamed along ffn
        ],
        out_specs=pl.BlockSpec((tm, h), lambda i, k: (i, 0)),  # one HBM writeback per token tile
        scratch_shapes=[pltpu.VMEM((tm, h), jnp.float32)],     # persistent f32 accumulator
        compiler_params=pltpu.CompilerParams(
            dimension_semantics=("parallel", "arbitrary"),
            vmem_limit_bytes=vmem_limit,
        ),
    )(x, w13, w2p)
    return out.reshape(b, s, h)


def _reference(hidden_state, w1, w3, w2, compute_dtype=jnp.bfloat16):
    """Mirrors the kernel numerics: bf16 operands, f32 MXU accumulation, f32 SiLU."""
    shp = hidden_state.shape
    x = hidden_state.reshape(-1, shp[-1]).astype(compute_dtype)
    w1c = w1.astype(compute_dtype)
    w3c = w3.astype(compute_dtype)
    w2c = w2.astype(compute_dtype)
    g = jnp.dot(x, w1c, preferred_element_type=jnp.float32)
    u = jnp.dot(x, w3c, preferred_element_type=jnp.float32)
    p = g * u
    a = p * jax.nn.sigmoid(p)
    out = jnp.dot(a.astype(compute_dtype), w2c, preferred_element_type=jnp.float32)
    return out.astype(hidden_state.dtype).reshape(shp)


if __name__ == "__main__":
    # Small shapes consistent with the module: batch=2, seq=8, hidden=32, ffn=64.
    batch, seq, hidden, ffn = 2, 8, 32, 64
    key = jax.random.PRNGKey(0)
    k_x, k1, k2, k3 = jax.random.split(key, 4)

    hidden_state = jax.random.normal(k_x, (batch, seq, hidden), dtype=jnp.float32)
    # Deterministic parameter init (~ nn.Linear U(-1/sqrt(in), 1/sqrt(in))),
    # stored pre-transposed as [in, out].
    w1 = jax.random.uniform(k1, (hidden, ffn), dtype=jnp.float32,
                            minval=-1.0, maxval=1.0) / jnp.sqrt(hidden)
    w3 = jax.random.uniform(k3, (hidden, ffn), dtype=jnp.float32,
                            minval=-1.0, maxval=1.0) / jnp.sqrt(hidden)
    w2 = jax.random.uniform(k2, (ffn, hidden), dtype=jnp.float32,
                            minval=-1.0, maxval=1.0) / jnp.sqrt(ffn)

    # Hoisted weight preparation (done once, outside the per-call hot path).
    tokens = batch * seq
    _, tf, _ = get_tile_config(tokens, hidden, ffn, out_dtype=hidden_state.dtype)
    prepared = prepare_weights(w1, w3, w2, tf)

    out = sparse_top2_mlp(hidden_state, w1, w3, w2, prepared=prepared)
    out = jax.block_until_ready(out)

    ref = _reference(hidden_state, w1, w3, w2)
    assert out.shape == (batch, seq, hidden)
    assert jnp.allclose(out, ref, atol=2e-2, rtol=2e-2), (
        float(jnp.max(jnp.abs(out - ref))))

    print("KERNEL_OK")
</pallas_src>

<mosaic_0001>
module attributes {stable_mosaic.version = 11 : i64} {
  func.func @_sparse_top2_mlp_kernel(%arg0: i32, %arg1: i32, %arg2: memref<16x32xbf16, #tpu.memory_space<vmem>>, %arg3: memref<32x128xbf16, #tpu.memory_space<vmem>>, %arg4: memref<64x32xbf16, #tpu.memory_space<vmem>>, %arg5: memref<16x32xf32, #tpu.memory_space<vmem>>, %arg6: memref<16x32xf32, #tpu.memory_space<vmem>>) attributes {dimension_semantics = [#tpu.dimension_semantics<parallel>, #tpu.dimension_semantics<arbitrary>], iteration_bounds = array<i64: 1, 1>, scalar_prefetch = 0 : i64, scratch_operands = 1 : i64, tpu.core_type = #tpu.core_type<tc>, window_params = [{transform_indices = @transform_0, window_bounds = array<i64: 16, 32>}, {transform_indices = @transform_1, window_bounds = array<i64: 32, 128>}, {transform_indices = @transform_2, window_bounds = array<i64: 64, 32>}, {transform_indices = @transform_3, window_bounds = array<i64: 16, 32>}]} {
    %c0_i32 = arith.constant 0 : i32
    %0 = arith.cmpi eq, %arg1, %c0_i32 : i32
    %1 = arith.extui %0 : i1 to i32
    %c0_i32_0 = arith.constant 0 : i32
    %2 = arith.cmpi ne, %1, %c0_i32_0 : i32
    scf.if %2 {
      %cst_14 = arith.constant 0.000000e+00 : f32
      %24 = vector.broadcast %cst_14 : f32 to vector<16x32xf32>
      %c0_15 = arith.constant 0 : index
      %c0_16 = arith.constant 0 : index
      %25 = vector.load %arg6[%c0_15, %c0_16] : memref<16x32xf32, #tpu.memory_space<vmem>>, vector<16x32xf32>
      tpu.vector_store %arg6[%c0_15, %c0_16], %24 {strides = array<i32>} : memref<16x32xf32, #tpu.memory_space<vmem>>, vector<16x32xf32>,
    } else {
    }
    %c0 = arith.constant 0 : index
    %c0_1 = arith.constant 0 : index
    %3 = vector.load %arg2[%c0, %c0_1] : memref<16x32xbf16, #tpu.memory_space<vmem>>, vector<16x32xbf16>
    %c0_2 = arith.constant 0 : index
    %c0_3 = arith.constant 0 : index
    %4 = vector.load %arg3[%c0_2, %c0_3] : memref<32x128xbf16, #tpu.memory_space<vmem>>, vector<32x128xbf16>
    %cst = arith.constant dense<0.000000e+00> : vector<16x128xf32>
    %5 = tpu.matmul %3, %4, %cst {dimension_numbers = #tpu.dot_dimension_numbers<[1], [0], [0], [1], [0, 0, 1, 1], [], []>} : vector<16x32xbf16>, vector<32x128xbf16>, vector<16x128xf32> -> vector<16x128xf32>
    %6 = vector.extract_strided_slice %5 {offsets = [0, 0], sizes = [16, 64], strides = [1, 1]} : vector<16x128xf32> to vector<16x64xf32>
    %7 = vector.extract_strided_slice %5 {offsets = [0, 64], sizes = [16, 64], strides = [1, 1]} : vector<16x128xf32> to vector<16x64xf32>
    %8 = arith.mulf %6, %7 : vector<16x64xf32>
    %9 = arith.negf %8 : vector<16x64xf32>
    %10 = math.exp %9 : vector<16x64xf32>
    %cst_4 = arith.constant 1.000000e+00 : f32
    %11 = vector.broadcast %cst_4 : f32 to vector<16x64xf32>
    %12 = arith.addf %11, %10 : vector<16x64xf32>
    %13 = arith.divf %11, %12 : vector<16x64xf32>
    %14 = arith.mulf %8, %13 : vector<16x64xf32>
    %c0_5 = arith.constant 0 : index
    %c0_6 = arith.constant 0 : index
    %15 = vector.load %arg6[%c0_5, %c0_6] : memref<16x32xf32, #tpu.memory_space<vmem>>, vector<16x32xf32>
    %16 = arith.truncf %14 : vector<16x64xf32> to vector<16x64xbf16>
    %c0_7 = arith.constant 0 : index
    %c0_8 = arith.constant 0 : index
    %17 = vector.load %arg4[%c0_7, %c0_8] : memref<64x32xbf16, #tpu.memory_space<vmem>>, vector<64x32xbf16>
    %cst_9 = arith.constant dense<0.000000e+00> : vector<16x32xf32>
    %18 = tpu.matmul %16, %17, %cst_9 {dimension_numbers = #tpu.dot_dimension_numbers<[1], [0], [0], [1], [0, 0, 1, 1], [], []>} : vector<16x64xbf16>, vector<64x32xbf16>, vector<16x32xf32> -> vector<16x32xf32>
    %19 = arith.addf %15, %18 : vector<16x32xf32>
    %c0_10 = arith.constant 0 : index
    %c0_11 = arith.constant 0 : index
    %20 = vector.load %arg6[%c0_10, %c0_11] : memref<16x32xf32, #tpu.memory_space<vmem>>, vector<16x32xf32>
    tpu.vector_store %arg6[%c0_10, %c0_11], %19 {strides = array<i32>} : memref<16x32xf32, #tpu.memory_space<vmem>>, vector<16x32xf32>,
    %c0_i32_12 = arith.constant 0 : i32
    %21 = arith.cmpi eq, %arg1, %c0_i32_12 : i32
    %22 = arith.extui %21 : i1 to i32
    %c0_i32_13 = arith.constant 0 : i32
    %23 = arith.cmpi ne, %22, %c0_i32_13 : i32
    scf.if %23 {
      %c0_14 = arith.constant 0 : index
      %c0_15 = arith.constant 0 : index
      %24 = vector.load %arg6[%c0_14, %c0_15] : memref<16x32xf32, #tpu.memory_space<vmem>>, vector<16x32xf32>
      %c0_16 = arith.constant 0 : index
      %c0_17 = arith.constant 0 : index
      %25 = vector.load %arg5[%c0_16, %c0_17] : memref<16x32xf32, #tpu.memory_space<vmem>>, vector<16x32xf32>
      tpu.vector_store %arg5[%c0_16, %c0_17], %24 {strides = array<i32>} : memref<16x32xf32, #tpu.memory_space<vmem>>, vector<16x32xf32>,
    } else {
    }
    return
  }
  func.func @transform_0(%arg0: i32, %arg1: i32) -> (i32, i32) {
    %c0_i32 = arith.constant 0 : i32
    %c0_i32_0 = arith.constant 0 : i32
    return %arg0, %c0_i32 : i32, i32
  }
  func.func @transform_1(%arg0: i32, %arg1: i32) -> (i32, i32) {
    %c0_i32 = arith.constant 0 : i32
    %c0_i32_0 = arith.constant 0 : i32
    return %c0_i32, %arg1 : i32, i32
  }
  func.func @transform_2(%arg0: i32, %arg1: i32) -> (i32, i32) {
    %c0_i32 = arith.constant 0 : i32
    %c0_i32_0 = arith.constant 0 : i32
    return %arg1, %c0_i32 : i32, i32
  }
  func.func @transform_3(%arg0: i32, %arg1: i32) -> (i32, i32) {
    %c0_i32 = arith.constant 0 : i32
    %c0_i32_0 = arith.constant 0 : i32
    return %arg0, %c0_i32 : i32, i32
  }
}

</mosaic_0001>

<bundles_post_ra>
// kernel: tpu_custom_call.1
= control target key start
LH: loop header
LB: loop body
LE: loop exit
PB: predicated region body
PF: predicated region fallthrough
CT: control target
= control target key end

     0   :  { %v306_v1 = vmov 0.0   ;;  %vm307_vm0 = vmmov 0   ;;  %vm20_vm1 = vcmask 261120   ;;  %s372_s0 = inlined_call_operand.vmem [shape: bf16[16,32], index: 0, kind: input, shape index: {}]   ;;  %s373_s1 = inlined_call_operand.vmem [shape: bf16[32,128], index: 1, kind: input, shape index: {}]   ;;  %s374_s2 = inlined_call_operand.vmem [shape: bf16[64,32], index: 2, kind: input, shape index: {}]   ;;  %s375_s3 = inlined_call_operand.hbm [shape: f32[16,32], index: 3, kind: output, shape index: {}]  }
   0x1   :  { %v267_v0 = vld [vmem:[%s373_s1] sm:$0xff]   ;;  %241 = vmatprep.subr.bf16.mxu0 %v306_v1  ;;  %249 = vmatprep.subr.bf16.mxu1 %v306_v1  ;;  %v268_v2 = vld [vmem:[%s373_s1 + $0x8] sm:$0xff]   ;;  %21 = vst.msk [vmem:[#allocation2] sm:$0xff] %vm20_vm1, %v306_v1  ;;  %22 = vst.msk [vmem:[#allocation2 + $0x8] sm:$0xff] %vm20_vm1, %v306_v1 }
   0x2   :  { %242 = vmatpush3.bf16.msra.mxu0 %v267_v0  ;;  %245 = vmatprep.mubr.msk.bf16.mxu0 %vm307_vm0, %v306_v1  ;;  %v269_v3 = vld [vmem:[%s372_s0] sm:$0xff]  }
   0x3   :  { %243 = vmatprep.subr.bf16.mxu0 %v306_v1  ;;  %257 = vmatprep.mubr.msk.bf16.mxu1 %vm307_vm0, %v306_v1 }
   0x4   :  { %8 = vsyncpa [#allocation4], 0  ;;  %s308_s18 = smov 64   ;;  %v270_v8 = vld [vmem:[%s374_s2] sm:$0xff]   ;;  %v271_v9 = vld [vmem:[%s374_s2 + $0x8] sm:$0xff]   ;;  %vm150_vm2 = vcmask 523264  }
   0x5   :  { %250 = vmatpush3.bf16.msra.mxu1 %v270_v8  ;;  %v272_v10 = vld [vmem:[%s374_s2 + $0x10] sm:$0xff]   ;;  %v273_v11 = vld [vmem:[%s374_s2 + $0x18] sm:$0xff]   ;;  %s309_s2 = smov [#allocation3]  }
   0x6   :  { %244 = vmatpush3.bf16.msra.mxu0 %v268_v2  ;;  %251 = vmatprep.subr.bf16.mxu1 %v306_v1  ;;  %s211_s25 = sshll.u32 %s309_s2, 4  ;;  %s212_s25 = int_to_ptr.vmem [resolvable:$true] %s211_s25 }
   0x7   :  { %s282_s26 = scalar_lea.vmem %s212_s25, 256  ;;  %p287_p1 = scmp.lt.s32.totalorder %s212_s25, %s212_s25 }
   0x8   :  { %v115_v27 = vld [vmem:[#allocation2] sm:$0xff]  ;;  %v116_v29 = vld [vmem:[#allocation2 + $0x8] sm:$0xff]  ;;  %p283_p0 = scmp.ne.s32.totalorder %s212_s25, %s282_s26  ;;  %p288_p2 = scmp.lt.s32.totalorder %s282_s26, %s282_s26 }
   0x9   :  { %246 = vmatmul.mubr.msk.bf16.vlgmr.msra.gmra.mrb[0].mxu0 %vm20_vm1, %v269_v3  ;;  %252 = vmatpush3.bf16.msra.mxu1 %v271_v9 }
   0xa   :  { %253 = vmatprep.subr.bf16.mxu1 %v306_v1  ;;  %p289_p3 = por %p288_p2, %p287_p1 }
   0xc   :  { %p290_p4 = pnand %p289_p3, %p283_p0 }
   0xd   :  { %254 = vmatpush3.bf16.msra.mxu1 %v272_v10 }
   0xe   :  { %255 = vmatprep.subr.bf16.mxu1 %v306_v1 }
  0x11   :  { %256 = vmatpush3.bf16.msra.mxu1 %v273_v11 }
  0xdc   :  { %v84_v4 = vpop.f32.mrb[0].mxu0 }
  0xdd   :  { %93 = vrot.lane.b32.xlu0 %v84_v4, %s308_s18  ;;  %v247_v5 = vpop.f32.mrb[1].mxu0 }
  0xde   :  { %v87_v6 = vpop.f32.mrb[2].mxu0 }
  0xdf   :  { %v248_v7 = vpop.f32.mrb[3].mxu0 }
  0xe1   :  { %95 = vrot.lane.b32.xlu0 %v87_v6, %s308_s18 }
 0x14f   :  { %v94_v12 = vpop.permute.xlu0 %93 }
 0x150   :  { %v99_v13 = vmul.f32 %v94_v12, %v84_v4 }
 0x152   :  { %v226_v14 = vmul.f32 -1.442695, %v99_v13 }
 0x153   :  { %v96_v15 = vpop.permute.xlu0 %95 }
 0x154   :  { %274 = vpow2.f32 %v226_v14  ;;  %v100_v16 = vmul.f32 %v96_v15, %v87_v6 }
 0x156   :  { %v227_v17 = vmul.f32 -1.442695, %v100_v16 }
 0x158   :  { %276 = vpow2.f32 %v227_v17 }
 0x15e   :  { %v275_v18 = vpop.eup %274 }
 0x15f   :  { %v107_v19 = vadd.f32 1.0, %v275_v18 }
 0x161   :  { %278 = vrcp.f32 %v107_v19 }
 0x162   :  { %v277_v20 = vpop.eup %276 }
 0x163   :  { %v108_v21 = vadd.f32 1.0, %v277_v20 }
 0x165   :  { %280 = vrcp.f32 %v108_v21 }
 0x16b   :  { %v279_v22 = vpop.eup %278 }
 0x16c   :  { %v113_v24 = vmul.f32 %v279_v22, %v99_v13 }
 0x16f   :  { %v281_v23 = vpop.eup %280 }
 0x170   :  { %v114_v25 = vmul.f32 %v281_v23, %v100_v16 }
 0x172   :  { %v117_v26 = vpack.c.bf16 %v114_v25, %v113_v24 }
 0x174   :  { %258 = vmatmul.mubr.msk.bf16.vlgmr.msra.gmra.mrb[0].mxu1 %vm150_vm2, %v117_v26 }
 0x247   :  { %v188_v28 = vpop.f32.mrb[0].mxu1 }
 0x248   :  { %v195_v30 = vadd.f32 %v188_v28, %v115_v27  ;;  %v259_v31 = vpop.f32.mrb[1].mxu1 }
 0x249   :  { %v191_v32 = vpop.f32.mrb[2].mxu1 }
 0x24a   :  { %197 = vst.msk [vmem:[#allocation2] sm:$0xff] %vm20_vm1, %v195_v30  ;;  %v196_v33 = vadd.f32 %v191_v32, %v116_v29  ;;  %v260_v34 = vpop.f32.mrb[3].mxu1 }
 0x24c   :  { %198 = vst.msk [vmem:[#allocation2 + $0x8] sm:$0xff] %vm20_vm1, %v196_v33 }
 0x251   :  { %v202_v35 = vld [vmem:[#allocation2] sm:$0xff] }
 0x252   :  { %204 = vst.msk [vmem:[#allocation3] sm:$0xff] %vm20_vm1, %v202_v35 }
 0x253   :  { %v203_v36 = vld [vmem:[#allocation2 + $0x8] sm:$0xff] }
 0x254   :  { %205 = vst.msk [vmem:[#allocation3 + $0x8] sm:$0xff] %vm20_vm1, %v203_v36 }
 0x255   :  { %293 = shalt.err (!%p290_p4)
}
 0x256   :  { %s294_s29 = scalar_lea.hbm %s375_s3, 256 }
 0x257   :  { %p295_p5 = scmp.ne.s32.totalorder %s375_s3, %s294_s29  ;;  %p298_p6 = scmp.lt.u32.totalorder %s294_s29, %s375_s3 }
 0x259   :  { %p300_p7 = pnand %p298_p6, %p295_p5 }
 0x25b   :  { %303 = shalt.err (!%p300_p7)
}
 0x25c   :  { %s310_s7 = smov 128   ;;  %s311_s8 = smov 8  }
 0x25d   :  { %217 = dma.vmem_to_hbm [thread:$0]  %s212_s25, 256, %s375_s3, [#allocation4], %s310_s7, %s310_s7, %s311_s8  }
 0x25e   :  { %304 = dma.done.wait [#allocation4], 256  }
 0x25f   :  { %305 = vsyncadd [#allocation4], 4294967040 }
 0x260   :  { %221 = vsyncpa [#allocation4], 1 }

</bundles_post_ra>
